<compile_context>
chip_gen: v7x
topology: tpu7x:2x2x1
jax: 0.10.0
libtpu: 0.0.40
codegen_flags: <defaults>
</compile_context>

<pallas_src>
import functools
import math

import jax
import jax.numpy as jnp
from jax.experimental import pallas as pl
from jax.experimental.pallas import tpu as pltpu


def _mcw_kernel_real(vr_ref, wr_ref, wi_ref, or_ref, oi_ref, *, B, C):
    """Real-V specialization of out = V * conj(W).

    Tiles (T = lane tile of the flattened spatial axis):
      vr: (B*C, T)   wr/wi: (C*C, T)   out_r/out_i: (B*C, T)
      out_r[b*C+h] =  sum_i vr[b*C+i] * wr[i*C+h]
      out_i[b*C+h] = -sum_i vr[b*C+i] * wi[i*C+h]
    """
    wr = wr_ref[...]
    wi = wi_ref[...]
    for b in range(B):
        acc_r = None
        acc_i = None
        for i in range(C):
            v = vr_ref[pl.ds(b * C + i, 1), :]        # (1, T) -> sublane broadcast
            tr = v * wr[i * C:(i + 1) * C, :]         # (C, T)
            ti = v * wi[i * C:(i + 1) * C, :]
            acc_r = tr if acc_r is None else acc_r + tr
            acc_i = ti if acc_i is None else acc_i + ti
        or_ref[pl.ds(b * C, C), :] = acc_r
        oi_ref[pl.ds(b * C, C), :] = -acc_i


def _mcw_kernel_cplx(vr_ref, vi_ref, wr_ref, wi_ref, or_ref, oi_ref, *, B, C):
    """General complex-V path: (Vr+iVi)*conj(Wr+iWi)."""
    wr = wr_ref[...]
    wi = wi_ref[...]
    for b in range(B):
        acc_r = None
        acc_i = None
        for i in range(C):
            vr = vr_ref[pl.ds(b * C + i, 1), :]
            vi = vi_ref[pl.ds(b * C + i, 1), :]
            wri = wr[i * C:(i + 1) * C, :]
            wii = wi[i * C:(i + 1) * C, :]
            tr = vr * wri + vi * wii
            ti = vi * wri - vr * wii
            acc_r = tr if acc_r is None else acc_r + tr
            acc_i = ti if acc_i is None else acc_i + ti
        or_ref[pl.ds(b * C, C), :] = acc_r
        oi_ref[pl.ds(b * C, C), :] = acc_i


def _pick_lane_tile(D, working_rows, *, max_lane_tile=2048,
                    vmem_budget_bytes=8 * 1024 * 1024):
    """Largest lane tile (multiple of 128, dividing D) whose double-buffered
    f32 working set fits a conservative VMEM budget (safe on v5e's 16 MiB
    scoped default and v7x's 64 MiB total)."""
    bytes_per_lane = 2 * working_rows * 4          # 2x for pipeline double-buffering
    cap = max(128, (vmem_budget_bytes // bytes_per_lane) // 128 * 128)
    upper = min(D, max_lane_tile, cap)
    # Once tiles are large, keep >= 2 grid steps so both v7x TensorCores get work.
    if D >= 2 * 512:
        upper = min(upper, max(512, D // 2))
    tile = 128
    t = 128
    while t <= upper:
        if D % t == 0:
            tile = t
        t += 128
    return tile


def prepare_weight(weight):
    """Split the complex (C, C, *dims) parameter into f32 real/imag planes laid
    out (C*C, D) (sublane- and lane-dense). Call once per parameter and cache;
    re-splitting every forward call doubles end-to-end HBM traffic."""
    C = weight.shape[0]
    assert weight.shape[1] == C
    D = math.prod(weight.shape[2:]) if len(weight.shape) > 2 else 1
    wr = jnp.real(weight).reshape(C * C, D).astype(jnp.float32)
    wi = jnp.imag(weight).reshape(C * C, D).astype(jnp.float32)
    return wr, wi


@functools.partial(jax.jit, static_argnames=("max_lane_tile",))
def multichannel_weight_forward(V, wr2, wi2, *, max_lane_tile=2048):
    """out[b, h, ...] = sum_i V[b, i, ...] * conj(W[i, h, ...]).

    V: (B, C, *dims), real or complex. wr2/wi2: (C*C, D) f32 planes from
    prepare_weight. Returns complex64 of shape (B, C, *dims).
    """
    B, C = V.shape[0], V.shape[1]
    dims = V.shape[2:]
    D = math.prod(dims) if dims else 1
    assert wr2.shape == (C * C, D) and wi2.shape == (C * C, D)
    # TODO(synk): pad + mask the lane axis for spatial sizes not a multiple of 128.
    assert D % 128 == 0, "flattened spatial size must be a multiple of 128"

    r8 = lambda n: -(-n // 8) * 8
    complex_input = jnp.iscomplexobj(V)
    n_v_planes = 2 if complex_input else 1
    working_rows = (n_v_planes + 2) * r8(B * C) + 2 * r8(C * C)
    lane_tile = _pick_lane_tile(D, working_rows, max_lane_tile=max_lane_tile)
    grid = (D // lane_tile,)

    v_spec = pl.BlockSpec((B * C, lane_tile), lambda t: (0, t))
    w_spec = pl.BlockSpec((C * C, lane_tile), lambda t: (0, t))
    o_spec = pl.BlockSpec((B * C, lane_tile), lambda t: (0, t))

    if complex_input:
        vr = jnp.real(V).reshape(B * C, D).astype(jnp.float32)
        vi = jnp.imag(V).reshape(B * C, D).astype(jnp.float32)
        kernel = functools.partial(_mcw_kernel_cplx, B=B, C=C)
        inputs = (vr, vi, wr2, wi2)
        in_specs = [v_spec, v_spec, w_spec, w_spec]
    else:
        vr = V.reshape(B * C, D).astype(jnp.float32)
        kernel = functools.partial(_mcw_kernel_real, B=B, C=C)
        inputs = (vr, wr2, wi2)
        in_specs = [v_spec, w_spec, w_spec]

    out_r, out_i = pl.pallas_call(
        kernel,
        out_shape=(
            jax.ShapeDtypeStruct((B * C, D), jnp.float32),
            jax.ShapeDtypeStruct((B * C, D), jnp.float32),
        ),
        grid_spec=pltpu.PrefetchScalarGridSpec(
            num_scalar_prefetch=0,
            grid=grid,
            in_specs=in_specs,
            out_specs=[o_spec, o_spec],
        ),
        compiler_params=pltpu.CompilerParams(
            dimension_semantics=("parallel",),
        ),
    )(*inputs)

    out = jax.lax.complex(out_r, out_i)   # complex64
    return out.reshape((B, C) + dims)


def multichannel_weight(V, weight, *, max_lane_tile=2048):
    """One-shot convenience matching MultichannelWeight.forward(V). Prefer
    caching prepare_weight(weight) across calls (weight is a parameter)."""
    wr2, wi2 = prepare_weight(weight)
    return multichannel_weight_forward(V, wr2, wi2, max_lane_tile=max_lane_tile)


if __name__ == "__main__":
    # Small shapes consistent with the module: batch=2, channels=4, spatial=16x16.
    B, C, H, W = 2, 4, 16, 16

    key = jax.random.PRNGKey(0)
    kv, kvi, kwr, kwi = jax.random.split(key, 4)

    # Input V (real, gets cast to complex64 inside forward, as in PyTorch).
    V = jax.random.normal(kv, (B, C, H, W), dtype=jnp.float32)

    # Deterministic "randn" complex weight of shape (channels, channels, *dimension).
    w_real = jax.random.normal(kwr, (C, C, H, W), dtype=jnp.float32)
    w_imag = jax.random.normal(kwi, (C, C, H, W), dtype=jnp.float32)
    weight = (w_real + 1j * w_imag).astype(jnp.complex64)

    # Weight planes prepared once (parameter), reused across forward calls.
    wr2, wi2 = prepare_weight(weight)

    # Real-V path (matches the PyTorch module's usual use).
    out = multichannel_weight_forward(V, wr2, wi2)
    out = jax.block_until_ready(out)

    ref = jnp.einsum("bi...,ih...->bh...", V.astype(jnp.complex64), jnp.conj(weight))
    assert out.shape == (B, C, H, W)
    assert out.dtype == jnp.complex64
    assert jnp.allclose(out, ref, atol=1e-4, rtol=1e-4)

    # Complex-V path (module accepts any V castable to complex64).
    Vc = (V + 1j * jax.random.normal(kvi, (B, C, H, W), dtype=jnp.float32)).astype(jnp.complex64)
    out_c = jax.block_until_ready(multichannel_weight_forward(Vc, wr2, wi2))
    ref_c = jnp.einsum("bi...,ih...->bh...", Vc, jnp.conj(weight))
    assert jnp.allclose(out_c, ref_c, atol=1e-4, rtol=1e-4)

    print("KERNEL_OK")
</pallas_src>

<mosaic_0001>
module attributes {stable_mosaic.version = 11 : i64} {
  func.func @_mcw_kernel_real(%arg0: i32, %arg1: memref<8x256xf32, #tpu.memory_space<vmem>>, %arg2: memref<16x256xf32, #tpu.memory_space<vmem>>, %arg3: memref<16x256xf32, #tpu.memory_space<vmem>>, %arg4: memref<8x256xf32, #tpu.memory_space<vmem>>, %arg5: memref<8x256xf32, #tpu.memory_space<vmem>>) attributes {dimension_semantics = [#tpu.dimension_semantics<parallel>], iteration_bounds = array<i64: 1>, scalar_prefetch = 0 : i64, scratch_operands = 0 : i64, tpu.core_type = #tpu.core_type<tc>, window_params = [{transform_indices = @transform_0, window_bounds = array<i64: 8, 256>}, {transform_indices = @transform_1, window_bounds = array<i64: 16, 256>}, {transform_indices = @transform_2, window_bounds = array<i64: 16, 256>}, {transform_indices = @transform_3, window_bounds = array<i64: 8, 256>}, {transform_indices = @transform_4, window_bounds = array<i64: 8, 256>}]} {
    %c0 = arith.constant 0 : index
    %c0_0 = arith.constant 0 : index
    %0 = vector.load %arg2[%c0, %c0_0] : memref<16x256xf32, #tpu.memory_space<vmem>>, vector<16x256xf32>
    %c0_1 = arith.constant 0 : index
    %c0_2 = arith.constant 0 : index
    %1 = vector.load %arg3[%c0_1, %c0_2] : memref<16x256xf32, #tpu.memory_space<vmem>>, vector<16x256xf32>
    %c0_3 = arith.constant 0 : index
    %c0_4 = arith.constant 0 : index
    %2 = vector.load %arg1[%c0_3, %c0_4] : memref<8x256xf32, #tpu.memory_space<vmem>>, vector<1x256xf32>
    %3 = vector.extract_strided_slice %0 {offsets = [0, 0], sizes = [4, 256], strides = [1, 1]} : vector<16x256xf32> to vector<4x256xf32>
    %4 = vector.broadcast %2 : vector<1x256xf32> to vector<4x256xf32>
    %5 = arith.mulf %4, %3 : vector<4x256xf32>
    %6 = vector.extract_strided_slice %1 {offsets = [0, 0], sizes = [4, 256], strides = [1, 1]} : vector<16x256xf32> to vector<4x256xf32>
    %7 = vector.broadcast %2 : vector<1x256xf32> to vector<4x256xf32>
    %8 = arith.mulf %7, %6 : vector<4x256xf32>
    %c1 = arith.constant 1 : index
    %c0_5 = arith.constant 0 : index
    %9 = vector.load %arg1[%c1, %c0_5] : memref<8x256xf32, #tpu.memory_space<vmem>>, vector<1x256xf32>
    %10 = vector.extract_strided_slice %0 {offsets = [4, 0], sizes = [4, 256], strides = [1, 1]} : vector<16x256xf32> to vector<4x256xf32>
    %11 = vector.broadcast %9 : vector<1x256xf32> to vector<4x256xf32>
    %12 = arith.mulf %11, %10 : vector<4x256xf32>
    %13 = vector.extract_strided_slice %1 {offsets = [4, 0], sizes = [4, 256], strides = [1, 1]} : vector<16x256xf32> to vector<4x256xf32>
    %14 = vector.broadcast %9 : vector<1x256xf32> to vector<4x256xf32>
    %15 = arith.mulf %14, %13 : vector<4x256xf32>
    %16 = arith.addf %5, %12 : vector<4x256xf32>
    %17 = arith.addf %8, %15 : vector<4x256xf32>
    %c2 = arith.constant 2 : index
    %c0_6 = arith.constant 0 : index
    %18 = vector.load %arg1[%c2, %c0_6] : memref<8x256xf32, #tpu.memory_space<vmem>>, vector<1x256xf32>
    %19 = vector.extract_strided_slice %0 {offsets = [8, 0], sizes = [4, 256], strides = [1, 1]} : vector<16x256xf32> to vector<4x256xf32>
    %20 = vector.broadcast %18 : vector<1x256xf32> to vector<4x256xf32>
    %21 = arith.mulf %20, %19 : vector<4x256xf32>
    %22 = vector.extract_strided_slice %1 {offsets = [8, 0], sizes = [4, 256], strides = [1, 1]} : vector<16x256xf32> to vector<4x256xf32>
    %23 = vector.broadcast %18 : vector<1x256xf32> to vector<4x256xf32>
    %24 = arith.mulf %23, %22 : vector<4x256xf32>
    %25 = arith.addf %16, %21 : vector<4x256xf32>
    %26 = arith.addf %17, %24 : vector<4x256xf32>
    %c3 = arith.constant 3 : index
    %c0_7 = arith.constant 0 : index
    %27 = vector.load %arg1[%c3, %c0_7] : memref<8x256xf32, #tpu.memory_space<vmem>>, vector<1x256xf32>
    %28 = vector.extract_strided_slice %0 {offsets = [12, 0], sizes = [4, 256], strides = [1, 1]} : vector<16x256xf32> to vector<4x256xf32>
    %29 = vector.broadcast %27 : vector<1x256xf32> to vector<4x256xf32>
    %30 = arith.mulf %29, %28 : vector<4x256xf32>
    %31 = vector.extract_strided_slice %1 {offsets = [12, 0], sizes = [4, 256], strides = [1, 1]} : vector<16x256xf32> to vector<4x256xf32>
    %32 = vector.broadcast %27 : vector<1x256xf32> to vector<4x256xf32>
    %33 = arith.mulf %32, %31 : vector<4x256xf32>
    %34 = arith.addf %25, %30 : vector<4x256xf32>
    %35 = arith.addf %26, %33 : vector<4x256xf32>
    %c0_8 = arith.constant 0 : index
    %c0_9 = arith.constant 0 : index
    %36 = vector.load %arg4[%c0_8, %c0_9] : memref<8x256xf32, #tpu.memory_space<vmem>>, vector<4x256xf32>
    tpu.vector_store %arg4[%c0_8, %c0_9], %34 {strides = array<i32>} : memref<8x256xf32, #tpu.memory_space<vmem>>, vector<4x256xf32>,
    %cst = arith.constant 0.000000e+00 : f32
    %37 = vector.broadcast %cst : f32 to vector<4x256xf32>
    %38 = arith.subf %37, %35 : vector<4x256xf32>
    %c0_10 = arith.constant 0 : index
    %c0_11 = arith.constant 0 : index
    %39 = vector.load %arg5[%c0_10, %c0_11] : memref<8x256xf32, #tpu.memory_space<vmem>>, vector<4x256xf32>
    tpu.vector_store %arg5[%c0_10, %c0_11], %38 {strides = array<i32>} : memref<8x256xf32, #tpu.memory_space<vmem>>, vector<4x256xf32>,
    %c4 = arith.constant 4 : index
    %c0_12 = arith.constant 0 : index
    %40 = vector.load %arg1[%c4, %c0_12] : memref<8x256xf32, #tpu.memory_space<vmem>>, vector<1x256xf32>
    %41 = vector.extract_strided_slice %0 {offsets = [0, 0], sizes = [4, 256], strides = [1, 1]} : vector<16x256xf32> to vector<4x256xf32>
    %42 = vector.broadcast %40 : vector<1x256xf32> to vector<4x256xf32>
    %43 = arith.mulf %42, %41 : vector<4x256xf32>
    %44 = vector.extract_strided_slice %1 {offsets = [0, 0], sizes = [4, 256], strides = [1, 1]} : vector<16x256xf32> to vector<4x256xf32>
    %45 = vector.broadcast %40 : vector<1x256xf32> to vector<4x256xf32>
    %46 = arith.mulf %45, %44 : vector<4x256xf32>
    %c5 = arith.constant 5 : index
    %c0_13 = arith.constant 0 : index
    %47 = vector.load %arg1[%c5, %c0_13] : memref<8x256xf32, #tpu.memory_space<vmem>>, vector<1x256xf32>
    %48 = vector.extract_strided_slice %0 {offsets = [4, 0], sizes = [4, 256], strides = [1, 1]} : vector<16x256xf32> to vector<4x256xf32>
    %49 = vector.broadcast %47 : vector<1x256xf32> to vector<4x256xf32>
    %50 = arith.mulf %49, %48 : vector<4x256xf32>
    %51 = vector.extract_strided_slice %1 {offsets = [4, 0], sizes = [4, 256], strides = [1, 1]} : vector<16x256xf32> to vector<4x256xf32>
    %52 = vector.broadcast %47 : vector<1x256xf32> to vector<4x256xf32>
    %53 = arith.mulf %52, %51 : vector<4x256xf32>
    %54 = arith.addf %43, %50 : vector<4x256xf32>
    %55 = arith.addf %46, %53 : vector<4x256xf32>
    %c6 = arith.constant 6 : index
    %c0_14 = arith.constant 0 : index
    %56 = vector.load %arg1[%c6, %c0_14] : memref<8x256xf32, #tpu.memory_space<vmem>>, vector<1x256xf32>
    %57 = vector.extract_strided_slice %0 {offsets = [8, 0], sizes = [4, 256], strides = [1, 1]} : vector<16x256xf32> to vector<4x256xf32>
    %58 = vector.broadcast %56 : vector<1x256xf32> to vector<4x256xf32>
    %59 = arith.mulf %58, %57 : vector<4x256xf32>
    %60 = vector.extract_strided_slice %1 {offsets = [8, 0], sizes = [4, 256], strides = [1, 1]} : vector<16x256xf32> to vector<4x256xf32>
    %61 = vector.broadcast %56 : vector<1x256xf32> to vector<4x256xf32>
    %62 = arith.mulf %61, %60 : vector<4x256xf32>
    %63 = arith.addf %54, %59 : vector<4x256xf32>
    %64 = arith.addf %55, %62 : vector<4x256xf32>
    %c7 = arith.constant 7 : index
    %c0_15 = arith.constant 0 : index
    %65 = vector.load %arg1[%c7, %c0_15] : memref<8x256xf32, #tpu.memory_space<vmem>>, vector<1x256xf32>
    %66 = vector.extract_strided_slice %0 {offsets = [12, 0], sizes = [4, 256], strides = [1, 1]} : vector<16x256xf32> to vector<4x256xf32>
    %67 = vector.broadcast %65 : vector<1x256xf32> to vector<4x256xf32>
    %68 = arith.mulf %67, %66 : vector<4x256xf32>
    %69 = vector.extract_strided_slice %1 {offsets = [12, 0], sizes = [4, 256], strides = [1, 1]} : vector<16x256xf32> to vector<4x256xf32>
    %70 = vector.broadcast %65 : vector<1x256xf32> to vector<4x256xf32>
    %71 = arith.mulf %70, %69 : vector<4x256xf32>
    %72 = arith.addf %63, %68 : vector<4x256xf32>
    %73 = arith.addf %64, %71 : vector<4x256xf32>
    %c4_16 = arith.constant 4 : index
    %c0_17 = arith.constant 0 : index
    %74 = vector.load %arg4[%c4_16, %c0_17] : memref<8x256xf32, #tpu.memory_space<vmem>>, vector<4x256xf32>
    tpu.vector_store %arg4[%c4_16, %c0_17], %72 {strides = array<i32>} : memref<8x256xf32, #tpu.memory_space<vmem>>, vector<4x256xf32>,
    %cst_18 = arith.constant 0.000000e+00 : f32
    %75 = vector.broadcast %cst_18 : f32 to vector<4x256xf32>
    %76 = arith.subf %75, %73 : vector<4x256xf32>
    %c4_19 = arith.constant 4 : index
    %c0_20 = arith.constant 0 : index
    %77 = vector.load %arg5[%c4_19, %c0_20] : memref<8x256xf32, #tpu.memory_space<vmem>>, vector<4x256xf32>
    tpu.vector_store %arg5[%c4_19, %c0_20], %76 {strides = array<i32>} : memref<8x256xf32, #tpu.memory_space<vmem>>, vector<4x256xf32>,
    return
  }
  func.func @transform_0(%arg0: i32) -> (i32, i32) {
    %c0_i32 = arith.constant 0 : i32
    %c0_i32_0 = arith.constant 0 : i32
    return %c0_i32, %arg0 : i32, i32
  }
  func.func @transform_1(%arg0: i32) -> (i32, i32) {
    %c0_i32 = arith.constant 0 : i32
    %c0_i32_0 = arith.constant 0 : i32
    return %c0_i32, %arg0 : i32, i32
  }
  func.func @transform_2(%arg0: i32) -> (i32, i32) {
    %c0_i32 = arith.constant 0 : i32
    %c0_i32_0 = arith.constant 0 : i32
    return %c0_i32, %arg0 : i32, i32
  }
  func.func @transform_3(%arg0: i32) -> (i32, i32) {
    %c0_i32 = arith.constant 0 : i32
    %c0_i32_0 = arith.constant 0 : i32
    return %c0_i32, %arg0 : i32, i32
  }
  func.func @transform_4(%arg0: i32) -> (i32, i32) {
    %c0_i32 = arith.constant 0 : i32
    %c0_i32_0 = arith.constant 0 : i32
    return %c0_i32, %arg0 : i32, i32
  }
}

</mosaic_0001>

<bundles_post_ra>
// kernel: custom-call
= control target key start
LH: loop header
LB: loop body
LE: loop exit
PB: predicated region body
PF: predicated region fallthrough
CT: control target
= control target key end

     0   :  { %s126_s0 = inlined_call_operand.vmem [shape: f32[2,4,16,16], index: 0, kind: input, shape index: {}]   ;;  %s127_s1 = inlined_call_operand.vmem [shape: f32[2,4,16,16], index: 1, kind: input, shape index: {}]   ;;  %s128_s2 = inlined_call_operand.hbm [shape: c64[2,4,16,16], index: 2, kind: output, shape index: {}]  }
   0x1   :  { %s87_s11 = scalar_lea.hbm %s128_s2, 2048 }
   0x2   :  { %4 = vsyncpa [#allocation0], 0  ;;  %s5_s14 = sshll.u32 %s126_s0, 4  ;;  %s6_s14 = int_to_ptr.vmem [resolvable:$true] %s5_s14 }
   0x3   :  { %s18_s15 = scalar_lea.vmem %s6_s14, 2048  ;;  %p23_p1 = scmp.lt.s32.totalorder %s6_s14, %s6_s14 }
   0x4   :  { %p19_p0 = scmp.ne.s32.totalorder %s6_s14, %s18_s15  ;;  %p24_p2 = scmp.lt.s32.totalorder %s18_s15, %s18_s15 }
   0x6   :  { %p25_p3 = por %p24_p2, %p23_p1 }
   0x8   :  { %p26_p4 = pnand %p25_p3, %p19_p0 }
   0xa   :  { %29 = shalt.err (!%p26_p4)  }
   0xb   :  { %p31_p5 = scmp.ne.s32.totalorder %s128_s2, %s87_s11  ;;  %s32_s0 = scalar_lea.hbm %s128_s2, 4096 }
   0xc   :  { %p33_p6 = scmp.lt.u32.totalorder %s32_s0, %s87_s11  ;;  %p34_p7 = scmp.lt.u32.totalorder %s87_s11, %s128_s2 }
   0xe   :  { %p35_p8 = por %p34_p7, %p33_p6 }
  0x10   :  { %p36_p9 = pnand %p35_p8, %p31_p5 }
  0x12   :  { %39 = shalt.err (!%p36_p9)  }
  0x13   :  { %8 = dma.vmem_to_hbm [thread:$0]  %s6_s14, 2048, %s128_s2, [#allocation0] }
  0x14   :  { %65 = dma.done.wait [#allocation0], 2048  }
  0x15   :  { %66 = vsyncadd [#allocation0], 4294965248 }
  0x16   :  { %10 = vsyncpa [#allocation0], 1 }
  0x17   :  { %11 = vsyncpa [#allocation1], 0  ;;  %s12_s28 = sshll.u32 %s127_s1, 4  ;;  %s13_s28 = int_to_ptr.vmem [resolvable:$true] %s12_s28 }
  0x18   :  { %s40_s29 = scalar_lea.vmem %s13_s28, 2048  ;;  %p45_p11 = scmp.lt.s32.totalorder %s13_s28, %s13_s28 }
  0x19   :  { %p41_p10 = scmp.ne.s32.totalorder %s13_s28, %s40_s29  ;;  %p46_p12 = scmp.lt.s32.totalorder %s40_s29, %s40_s29 }
  0x1b   :  { %p47_p13 = por %p46_p12, %p45_p11 }
  0x1d   :  { %p48_p0 = pnand %p47_p13, %p41_p10 }
  0x1f   :  { %51 = shalt.err (!%p48_p0)  }
  0x20   :  { %p53_p1 = scmp.ne.s32.totalorder %s87_s11, %s32_s0  ;;  %p56_p2 = scmp.lt.u32.totalorder %s32_s0, %s32_s0 }
  0x22   :  { %p57_p3 = por %p56_p2, %p34_p7 }
  0x24   :  { %p59_p4 = por %p57_p3, %p33_p6 }
  0x26   :  { %p60_p5 = pnand %p59_p4, %p53_p1 }
  0x28   :  { %63 = shalt.err (!%p60_p5)  }
  0x29   :  { %15 = dma.vmem_to_hbm [thread:$0]  %s13_s28, 2048, %s87_s11, [#allocation1] }
  0x2a   :  { %67 = dma.done.wait [#allocation1], 2048  }
  0x2b   :  { %68 = vsyncadd [#allocation1], 4294965248 }
  0x2c   :  { %17 = vsyncpa [#allocation1], 1 }

// kernel: multichannel_weight_forward.1
= control target key start
LH: loop header
LB: loop body
LE: loop exit
PB: predicated region body
PF: predicated region fallthrough
CT: control target
= control target key end

     0   :  { %v26_v0 = vlaneseq  ;;  %s417_s0 = inlined_call_operand.vmem [shape: f32[8,256], index: 0, kind: input, shape index: {}]   ;;  %s418_s1 = inlined_call_operand.vmem [shape: f32[16,256], index: 1, kind: input, shape index: {}]   ;;  %s419_s2 = inlined_call_operand.vmem [shape: f32[16,256], index: 2, kind: input, shape index: {}]   ;;  %s420_s3 = inlined_call_operand.vmem [shape: f32[8,256], index: 3, kind: output, shape index: {0}]   ;;  %s421_s4 = inlined_call_operand.vmem [shape: f32[8,256], index: 4, kind: output, shape index: {1}]  }
   0x1   :  { %v24_v1 = vld [vmem:[%s417_s0] ss:$8 sm:$0x3]  ;;  %v263_v3 = vld [vmem:[%s417_s0 + $0x1] ss:$8 sm:$0x3] }
   0x2   :  { %v27_v2 = vshrl.u32 %v26_v0, 7  ;;  %v264_v4 = vld [vmem:[%s417_s0 + $0x2] ss:$8 sm:$0x3]  ;;  %v321_v13 = vld [vmem:[%s418_s1 + $0x10] sm:$0xff]  ;;  %v335_v23 = vld [vmem:[%s418_s1 + $0x18] sm:$0xff] }
   0x3   :  { %v265_v5 = vld [vmem:[%s417_s0 + $0x3] ss:$8 sm:$0x3]  ;;  %v347_v31 = vld [vmem:[%s419_s2 + $0x10] sm:$0xff]  ;;  %v365_v43 = vld [vmem:[%s419_s2 + $0x18] sm:$0xff] }
   0x4   :  { %v307_v6 = vsub.s32 0, %v27_v2  ;;  %v309_v7 = vsub.s32 1, %v27_v2  ;;  %v16_v12 = vld [vmem:[%s418_s1] sm:$0xff]  ;;  %v17_v22 = vld [vmem:[%s418_s1 + $0x8] sm:$0xff] }
   0x5   :  { %v342_v28 = vld [vmem:[%s419_s2] sm:$0xff]  ;;  %v21_v39 = vld [vmem:[%s419_s2 + $0x8] sm:$0xff] }
   0x6   :  { %v29_v8 = vrot.slane %v24_v1, %v307_v6  ;;  %v46_v9 = vrot.slane %v263_v3, %v307_v6  ;;  %v79_v10 = vrot.slane %v264_v4, %v307_v6  ;;  %v100_v11 = vrot.slane %v265_v5, %v307_v6  ;;  %v266_v34 = vld [vmem:[%s417_s0 + $0x4] ss:$8 sm:$0x3]  ;;  %v267_v40 = vld [vmem:[%s417_s0 + $0x5] ss:$8 sm:$0x3] }
   0x7   :  { %v33_v14 = vrot.slane %v24_v1, %v309_v7  ;;  %v50_v15 = vrot.slane %v263_v3, %v309_v7  ;;  %v83_v16 = vrot.slane %v264_v4, %v309_v7  ;;  %v104_v17 = vrot.slane %v265_v5, %v309_v7  ;;  %v268_v46 = vld [vmem:[%s417_s0 + $0x6] ss:$8 sm:$0x3]  ;;  %v269_v55 = vld [vmem:[%s417_s0 + $0x7] ss:$8 sm:$0x3] }
   0x8   :  { %v36_v18 = vmul.f32 %v29_v8, %v16_v12  ;;  %v53_v19 = vmul.f32 %v46_v9, %v16_v12  ;;  %v86_v20 = vmul.f32 %v79_v10, %v321_v13  ;;  %v107_v21 = vmul.f32 %v100_v11, %v321_v13 }
   0x9   :  { %v37_v24 = vmul.f32 %v33_v14, %v17_v22  ;;  %v54_v25 = vmul.f32 %v50_v15, %v17_v22  ;;  %v87_v26 = vmul.f32 %v83_v16, %v335_v23  ;;  %v108_v27 = vmul.f32 %v104_v17, %v335_v23 }
   0xa   :  { %v59_v29 = vrot.slane %v53_v19, 4  ;;  %v113_v30 = vrot.slane %v107_v21, 4  ;;  %v38_v32 = vmul.f32 %v29_v8, %v342_v28  ;;  %v55_v33 = vmul.f32 %v46_v9, %v342_v28 }
   0xb   :  { %v60_v35 = vrot.slane %v54_v25, 4  ;;  %v114_v36 = vrot.slane %v108_v27, 4  ;;  %v88_v37 = vmul.f32 %v79_v10, %v347_v31  ;;  %v109_v38 = vmul.f32 %v100_v11, %v347_v31 }
   0xc   :  { %v63_v41 = vadd.f32 %v59_v29, %v36_v18  ;;  %v67_v42 = vrot.slane %v55_v33, 4  ;;  %v39_v44 = vmul.f32 %v33_v14, %v21_v39  ;;  %v56_v45 = vmul.f32 %v50_v15, %v21_v39 }
   0xd   :  { %v64_v47 = vadd.f32 %v60_v35, %v37_v24  ;;  %v121_v48 = vrot.slane %v109_v38, 4  ;;  %v89_v49 = vmul.f32 %v83_v16, %v365_v43  ;;  %v110_v50 = vmul.f32 %v104_v17, %v365_v43 }
   0xe   :  { %v90_v51 = vadd.f32 %v86_v20, %v63_v41  ;;  %v71_v52 = vadd.f32 %v67_v42, %v38_v32  ;;  %v68_v53 = vrot.slane %v56_v45, 4  ;;  %v139_v54 = vrot.slane %v266_v34, %v307_v6 }
   0xf   :  { %v91_v56 = vadd.f32 %v87_v26, %v64_v47  ;;  %v122_v57 = vrot.slane %v110_v50, 4  ;;  %v156_v58 = vrot.slane %v267_v40, %v307_v6  ;;  %v189_v59 = vrot.slane %v268_v46, %v307_v6 }
  0x10   :  { %v117_v60 = vadd.f32 %v113_v30, %v90_v51  ;;  %v92_v61 = vadd.f32 %v88_v37, %v71_v52  ;;  %v72_v62 = vadd.f32 %v68_v53, %v39_v44  ;;  %v146_v63 = vmul.f32 %v139_v54, %v16_v12 }
  0x11   :  { %v118_v0 = vadd.f32 %v114_v36, %v91_v56  ;;  %v163_v1 = vmul.f32 %v156_v58, %v16_v12  ;;  %v196_v2 = vmul.f32 %v189_v59, %v321_v13  ;;  %v210_v3 = vrot.slane %v269_v55, %v307_v6 }
  0x12   :  { %127 = vst [vmem:[%s420_s3] sm:$0xf] %v117_v60  ;;  %v125_v4 = vadd.f32 %v121_v48, %v92_v61  ;;  %v93_v5 = vadd.f32 %v89_v49, %v72_v62  ;;  %v143_v8 = vrot.slane %v266_v34, %v309_v7  ;;  %v160_v9 = vrot.slane %v267_v40, %v309_v7 }
  0x13   :  { %128 = vst [vmem:[%s420_s3 + $0x8] sm:$0xf] %v118_v0  ;;  %v169_v10 = vrot.slane %v163_v1, 4  ;;  %v217_v11 = vmul.f32 %v210_v3, %v321_v13  ;;  %v193_v12 = vrot.slane %v268_v46, %v309_v7  ;;  %v214_v6 = vrot.slane %v269_v55, %v309_v7 }
  0x14   :  { %v129_v14 = vsub.f32 0.0, %v125_v4  ;;  %v126_v15 = vadd.f32 %v122_v57, %v93_v5  ;;  %v147_v16 = vmul.f32 %v143_v8, %v17_v22  ;;  %v164_v17 = vmul.f32 %v160_v9, %v17_v22 }
  0x15   :  { %v173_v18 = vadd.f32 %v169_v10, %v146_v63  ;;  %v223_v19 = vrot.slane %v217_v11, 4  ;;  %v197_v20 = vmul.f32 %v193_v12, %v335_v23  ;;  %v218_v21 = vmul.f32 %v214_v6, %v335_v23 }
  0x16   :  { %131 = vst [vmem:[%s421_s4] sm:$0xf] %v129_v14  ;;  %v130_v24 = vsub.f32 0.0, %v126_v15  ;;  %v170_v13 = vrot.slane %v164_v17, 4  ;;  %v148_v25 = vmul.f32 %v139_v54, %v342_v28  ;;  %v165_v7 = vmul.f32 %v156_v58, %v342_v28 }
  0x17   :  { %v200_v26 = vadd.f32 %v196_v2, %v173_v18  ;;  %v224_v27 = vrot.slane %v218_v21, 4  ;;  %v198_v22 = vmul.f32 %v189_v59, %v347_v31  ;;  %v219_v29 = vmul.f32 %v210_v3, %v347_v31 }
  0x18   :  { %132 = vst [vmem:[%s421_s4 + $0x8] sm:$0xf] %v130_v24  ;;  %v174_v23 = vadd.f32 %v170_v13, %v147_v16  ;;  %v177_v30 = vrot.slane %v165_v7, 4  ;;  %v149_v32 = vmul.f32 %v143_v8, %v21_v39  ;;  %v166_v33 = vmul.f32 %v160_v9, %v21_v39 }
  0x19   :  { %v227_v34 = vadd.f32 %v223_v19, %v200_v26  ;;  %v231_v35 = vrot.slane %v219_v29, 4  ;;  %v220_v36 = vmul.f32 %v214_v6, %v365_v43  ;;  %v199_v40 = vmul.f32 %v193_v12, %v365_v43 }
  0x1a   :  { %v201_v37 = vadd.f32 %v197_v20, %v174_v23  ;;  %v181_v28 = vadd.f32 %v177_v30, %v148_v25  ;;  %v178_v38 = vrot.slane %v166_v33, 4 }
  0x1b   :  { %v239_v41 = vrot.slane %v227_v34, 4  ;;  %v232_v45 = vrot.slane %v220_v36, 4 }
  0x1c   :  { %v228_v42 = vadd.f32 %v224_v27, %v201_v37  ;;  %v202_v31 = vadd.f32 %v198_v22, %v181_v28  ;;  %v182_v44 = vadd.f32 %v178_v38, %v149_v32 }
  0x1d   :  { %243 = vst [vmem:[%s420_s3] sm:$0xf0] %v239_v41 }
  0x1e   :  { %v240_v46 = vrot.slane %v228_v42, 4  ;;  %v235_v39 = vadd.f32 %v231_v35, %v202_v31  ;;  %v203_v47 = vadd.f32 %v199_v40, %v182_v44 }
  0x20   :  { %244 = vst [vmem:[%s420_s3 + $0x8] sm:$0xf0] %v240_v46  ;;  %v245_v48 = vsub.f32 0.0, %v235_v39  ;;  %v236_v49 = vadd.f32 %v232_v45, %v203_v47 }
  0x22   :  { %v249_v50 = vrot.slane %v245_v48, 4  ;;  %v246_v43 = vsub.f32 0.0, %v236_v49 }
  0x24   :  { %253 = vst [vmem:[%s421_s4] sm:$0xf0] %v249_v50  ;;  %v250_v51 = vrot.slane %v246_v43, 4 }
  0x26   :  { %254 = vst [vmem:[%s421_s4 + $0x8] sm:$0xf0] %v250_v51 }

</bundles_post_ra>
